<compile_context>
chip_gen: v7x
topology: tpu7x:2x2x1
jax: 0.10.0
libtpu: 0.0.40
codegen_flags: <defaults>
</compile_context>

<pallas_src>
import numpy as np
import jax
import jax.numpy as jnp
from jax.experimental import pallas as pl
from jax.experimental.pallas import tpu as pltpu

SPLIT_SIZE = 224 // 4  # 56, fixed by the PyTorch module


def _chunk_sizes(total, split_size):
    """torch.split chunk sizes along the split axis (last chunk may be ragged)."""
    sizes = []
    rem = total
    while rem > 0:
        s = min(split_size, rem)
        sizes.append(s)
        rem -= s
    return sizes


def split_pallas(x, split_size=SPLIT_SIZE, dim=3):
    """Pallas implementation of torch.split(x, split_size, dim=3) on NCHW."""
    assert dim == 3 and x.ndim == 4, "kernel written for 4-D NCHW, split on dim 3"
    N, C, H, W = x.shape

    sizes = _chunk_sizes(W, split_size)
    offsets = np.concatenate([[0], np.cumsum(sizes)[:-1]]).astype(int).tolist()

    out_shapes = tuple(
        jax.ShapeDtypeStruct((N, C, H, s), x.dtype) for s in sizes
    )

    def kernel(x_ref, *out_refs):
        # Input resides fully in VMEM; each chunk is a static lane-slice
        # written directly into its own output block.
        for o_ref, off, s in zip(out_refs, offsets, sizes):
            o_ref[...] = x_ref[:, :, :, off:off + s]

    return pl.pallas_call(
        kernel,
        grid=(1,),
        in_specs=[
            # Full-array block: one HBM->VMEM DMA, exempt from (8,128) rule.
            pl.BlockSpec((N, C, H, W), lambda i: (0, 0, 0, 0)),
        ],
        out_specs=tuple(
            # Each chunk is its own output; full-dims block -> exempt as well.
            pl.BlockSpec((N, C, H, s), lambda i: (0, 0, 0, 0)) for s in sizes
        ),
        out_shape=out_shapes,
        compiler_params=pltpu.CompilerParams(
            dimension_semantics=("arbitrary",)),
    )(x)


if __name__ == "__main__":
    # Shapes consistent with the module: split size 56 along dim 3; W = 224
    # gives 4 chunks of 56 each.  Other dims kept small.
    key = jax.random.PRNGKey(0)
    x = jax.random.normal(key, (2, 4, 16, 224), dtype=jnp.float32)

    outs = jax.block_until_ready(split_pallas(x))

    # Reference: plain NumPy slicing (torch.split semantics).
    sizes = _chunk_sizes(x.shape[3], SPLIT_SIZE)
    x_np = np.asarray(x)
    off = 0
    ok = len(outs) == len(sizes)
    for o, s in zip(outs, sizes):
        ref = x_np[:, :, :, off:off + s]
        ok &= tuple(o.shape) == ref.shape
        ok &= bool(np.array_equal(np.asarray(o), ref))
        off += s

    if ok:
        print("KERNEL_OK")
    else:
        raise SystemExit("mismatch vs reference split")
</pallas_src>

<mosaic_0001>
module attributes {stable_mosaic.version = 11 : i64} {
  func.func @kernel(%arg0: i32, %arg1: memref<2x4x16x224xf32, #tpu.memory_space<vmem>>, %arg2: memref<2x4x16x56xf32, #tpu.memory_space<vmem>>, %arg3: memref<2x4x16x56xf32, #tpu.memory_space<vmem>>, %arg4: memref<2x4x16x56xf32, #tpu.memory_space<vmem>>, %arg5: memref<2x4x16x56xf32, #tpu.memory_space<vmem>>) attributes {dimension_semantics = [#tpu.dimension_semantics<arbitrary>], iteration_bounds = array<i64: 1>, scalar_prefetch = 0 : i64, scratch_operands = 0 : i64, tpu.core_type = #tpu.core_type<tc>, window_params = [{pipeline_mode = #tpu.pipeline_mode<synchronous>, transform_indices = @transform_0, window_bounds = array<i64: 2, 4, 16, 224>}, {pipeline_mode = #tpu.pipeline_mode<synchronous>, transform_indices = @transform_1, window_bounds = array<i64: 2, 4, 16, 56>}, {pipeline_mode = #tpu.pipeline_mode<synchronous>, transform_indices = @transform_2, window_bounds = array<i64: 2, 4, 16, 56>}, {pipeline_mode = #tpu.pipeline_mode<synchronous>, transform_indices = @transform_3, window_bounds = array<i64: 2, 4, 16, 56>}, {pipeline_mode = #tpu.pipeline_mode<synchronous>, transform_indices = @transform_4, window_bounds = array<i64: 2, 4, 16, 56>}]} {
    %c0 = arith.constant 0 : index
    %c0_0 = arith.constant 0 : index
    %c0_1 = arith.constant 0 : index
    %c0_2 = arith.constant 0 : index
    %0 = vector.load %arg1[%c0, %c0_0, %c0_1, %c0_2] : memref<2x4x16x224xf32, #tpu.memory_space<vmem>>, vector<2x4x16x56xf32>
    %c0_3 = arith.constant 0 : index
    %c0_4 = arith.constant 0 : index
    %c0_5 = arith.constant 0 : index
    %c0_6 = arith.constant 0 : index
    %1 = vector.load %arg2[%c0_3, %c0_4, %c0_5, %c0_6] : memref<2x4x16x56xf32, #tpu.memory_space<vmem>>, vector<2x4x16x56xf32>
    tpu.vector_store %arg2[%c0_3, %c0_4, %c0_5, %c0_6], %0 {strides = array<i32>} : memref<2x4x16x56xf32, #tpu.memory_space<vmem>>, vector<2x4x16x56xf32>,
    %c0_7 = arith.constant 0 : index
    %c0_8 = arith.constant 0 : index
    %c0_9 = arith.constant 0 : index
    %c56 = arith.constant 56 : index
    %2 = vector.load %arg1[%c0_7, %c0_8, %c0_9, %c56] : memref<2x4x16x224xf32, #tpu.memory_space<vmem>>, vector<2x4x16x56xf32>
    %c0_10 = arith.constant 0 : index
    %c0_11 = arith.constant 0 : index
    %c0_12 = arith.constant 0 : index
    %c0_13 = arith.constant 0 : index
    %3 = vector.load %arg3[%c0_10, %c0_11, %c0_12, %c0_13] : memref<2x4x16x56xf32, #tpu.memory_space<vmem>>, vector<2x4x16x56xf32>
    tpu.vector_store %arg3[%c0_10, %c0_11, %c0_12, %c0_13], %2 {strides = array<i32>} : memref<2x4x16x56xf32, #tpu.memory_space<vmem>>, vector<2x4x16x56xf32>,
    %c0_14 = arith.constant 0 : index
    %c0_15 = arith.constant 0 : index
    %c0_16 = arith.constant 0 : index
    %c112 = arith.constant 112 : index
    %4 = vector.load %arg1[%c0_14, %c0_15, %c0_16, %c112] : memref<2x4x16x224xf32, #tpu.memory_space<vmem>>, vector<2x4x16x56xf32>
    %c0_17 = arith.constant 0 : index
    %c0_18 = arith.constant 0 : index
    %c0_19 = arith.constant 0 : index
    %c0_20 = arith.constant 0 : index
    %5 = vector.load %arg4[%c0_17, %c0_18, %c0_19, %c0_20] : memref<2x4x16x56xf32, #tpu.memory_space<vmem>>, vector<2x4x16x56xf32>
    tpu.vector_store %arg4[%c0_17, %c0_18, %c0_19, %c0_20], %4 {strides = array<i32>} : memref<2x4x16x56xf32, #tpu.memory_space<vmem>>, vector<2x4x16x56xf32>,
    %c0_21 = arith.constant 0 : index
    %c0_22 = arith.constant 0 : index
    %c0_23 = arith.constant 0 : index
    %c168 = arith.constant 168 : index
    %6 = vector.load %arg1[%c0_21, %c0_22, %c0_23, %c168] : memref<2x4x16x224xf32, #tpu.memory_space<vmem>>, vector<2x4x16x56xf32>
    %c0_24 = arith.constant 0 : index
    %c0_25 = arith.constant 0 : index
    %c0_26 = arith.constant 0 : index
    %c0_27 = arith.constant 0 : index
    %7 = vector.load %arg5[%c0_24, %c0_25, %c0_26, %c0_27] : memref<2x4x16x56xf32, #tpu.memory_space<vmem>>, vector<2x4x16x56xf32>
    tpu.vector_store %arg5[%c0_24, %c0_25, %c0_26, %c0_27], %6 {strides = array<i32>} : memref<2x4x16x56xf32, #tpu.memory_space<vmem>>, vector<2x4x16x56xf32>,
    return
  }
  func.func @transform_0(%arg0: i32) -> (i32, i32, i32, i32) {
    %c0_i32 = arith.constant 0 : i32
    %c0_i32_0 = arith.constant 0 : i32
    %c0_i32_1 = arith.constant 0 : i32
    %c0_i32_2 = arith.constant 0 : i32
    %c0_i32_3 = arith.constant 0 : i32
    return %c0_i32, %c0_i32_0, %c0_i32_1, %c0_i32_2 : i32, i32, i32, i32
  }
  func.func @transform_1(%arg0: i32) -> (i32, i32, i32, i32) {
    %c0_i32 = arith.constant 0 : i32
    %c0_i32_0 = arith.constant 0 : i32
    %c0_i32_1 = arith.constant 0 : i32
    %c0_i32_2 = arith.constant 0 : i32
    %c0_i32_3 = arith.constant 0 : i32
    return %c0_i32, %c0_i32_0, %c0_i32_1, %c0_i32_2 : i32, i32, i32, i32
  }
  func.func @transform_2(%arg0: i32) -> (i32, i32, i32, i32) {
    %c0_i32 = arith.constant 0 : i32
    %c0_i32_0 = arith.constant 0 : i32
    %c0_i32_1 = arith.constant 0 : i32
    %c0_i32_2 = arith.constant 0 : i32
    %c0_i32_3 = arith.constant 0 : i32
    return %c0_i32, %c0_i32_0, %c0_i32_1, %c0_i32_2 : i32, i32, i32, i32
  }
  func.func @transform_3(%arg0: i32) -> (i32, i32, i32, i32) {
    %c0_i32 = arith.constant 0 : i32
    %c0_i32_0 = arith.constant 0 : i32
    %c0_i32_1 = arith.constant 0 : i32
    %c0_i32_2 = arith.constant 0 : i32
    %c0_i32_3 = arith.constant 0 : i32
    return %c0_i32, %c0_i32_0, %c0_i32_1, %c0_i32_2 : i32, i32, i32, i32
  }
  func.func @transform_4(%arg0: i32) -> (i32, i32, i32, i32) {
    %c0_i32 = arith.constant 0 : i32
    %c0_i32_0 = arith.constant 0 : i32
    %c0_i32_1 = arith.constant 0 : i32
    %c0_i32_2 = arith.constant 0 : i32
    %c0_i32_3 = arith.constant 0 : i32
    return %c0_i32, %c0_i32_0, %c0_i32_1, %c0_i32_2 : i32, i32, i32, i32
  }
}

</mosaic_0001>

<bundles_post_ra>
// kernel: tpu_custom_call.1
= control target key start
LH: loop header
LB: loop body
LE: loop exit
PB: predicated region body
PF: predicated region fallthrough
CT: control target
= control target key end

     0   :  { %10 = vsyncpa [#allocation3], 0  ;;  %s897_s0 = inlined_call_operand.hbm [shape: f32[2,4,16,224], index: 0, kind: input, shape index: {}]   ;;  %s898_s1 = inlined_call_operand.hbm [shape: f32[2,4,16,56], index: 1, kind: output, shape index: {0}]   ;;  %s899_s2 = inlined_call_operand.hbm [shape: f32[2,4,16,56], index: 2, kind: output, shape index: {1}]   ;;  %s900_s3 = inlined_call_operand.hbm [shape: f32[2,4,16,56], index: 3, kind: output, shape index: {2}]   ;;  %s901_s4 = inlined_call_operand.hbm [shape: f32[2,4,16,56], index: 4, kind: output, shape index: {3}]  }
   0x1   :  { %11 = vsyncpa [#allocation4], 0 }
   0x2   :  { %12 = vsyncpa [#allocation7], 0 }
   0x3   :  { %13 = vsyncpa [#allocation10], 0  ;;  %s624_s15 = smov [#allocation2]   ;;  %s506_s19 = scalar_lea.hbm %s897_s0, 4096 }
   0x4   :  { %s19_s16 = sshll.u32 %s624_s15, 4  ;;  %p507_p0 = scmp.ne.s32.totalorder %s897_s0, %s506_s19  ;;  %s20_s16 = int_to_ptr.vmem [resolvable:$true] %s19_s16 }
   0x5   :  { %p510_p1 = scmp.lt.u32.totalorder %s506_s19, %s897_s0 }
   0x7   :  { %p512_p2 = pnand %p510_p1, %p507_p0 }
   0x9   :  { %515 = shalt.err (!%p512_p2)
}
   0xa   :  { %s516_s24 = scalar_lea.vmem %s20_s16, 4096  ;;  %p521_p4 = scmp.lt.s32.totalorder %s20_s16, %s20_s16 }
   0xb   :  { %p517_p3 = scmp.ne.s32.totalorder %s20_s16, %s516_s24  ;;  %p522_p5 = scmp.lt.s32.totalorder %s516_s24, %s516_s24 }
   0xd   :  { %p523_p6 = por %p522_p5, %p521_p4 }
   0xf   :  { %p524_p7 = pnand %p523_p6, %p517_p3 }
  0x11   :  { %527 = shalt.err (!%p524_p7)
}
  0x12   :  { %s625_s25 = smov 256   ;;  %s626_s26 = smov 16  }
  0x13   :  { %25 = dma.hbm_to_vmem [thread:$0]  %s897_s0, 4096, %s20_s16, [#allocation3], %s625_s25, %s625_s25, %s626_s26  }
  0x14   :  { %616 = dma.done.wait [#allocation3], 4096  }
  0x15   :  { %617 = vsyncadd [#allocation3], 4294963200  ;;  %v64_v0 = vld [vmem:[#allocation2 + $0x20] sm:$0xff]  ;;  %v65_v2 = vld [vmem:[#allocation2 + $0x30] sm:$0xff]  ;;  %vm45_vm0 = vcmask 457728   ;;  %s627_s29 = smov 72  }
  0x16   :  { %v62_v1 = vld [vmem:[#allocation2] sm:$0xff]  ;;  %98 = vrot.lane.b32.xlu1 %v64_v0, %s627_s29  ;;  %v63_v3 = vld [vmem:[#allocation2 + $0x10] sm:$0xff]  ;;  %48 = vst.msk [vmem:[#allocation5 + $0x10] sm:$0xff] %vm45_vm0, %v64_v0  ;;  %49 = vst.msk [vmem:[#allocation5 + $0x18] sm:$0xff] %vm45_vm0, %v65_v2  ;;  %s628_s0 = smov 88   ;;  %s629_s30 = smov [#allocation5]  }
  0x17   :  { %94 = vrot.lane.b32.xlu0 %v62_v1, %s627_s29  ;;  %v67_v4 = vld [vmem:[#allocation2 + $0x50] sm:$0xff]  ;;  %v66_v5 = vld [vmem:[#allocation2 + $0x40] sm:$0xff]  ;;  %46 = vst.msk [vmem:[#allocation5] sm:$0xff] %vm45_vm0, %v62_v1  ;;  %47 = vst.msk [vmem:[#allocation5 + $0x8] sm:$0xff] %vm45_vm0, %v63_v3  ;;  %s436_s5 = sshll.u32 %s629_s30, 4  ;;  %s437_s5 = int_to_ptr.vmem [resolvable:$true] %s436_s5 }
  0x18   :  { %v69_v6 = vld [vmem:[#allocation2 + $0x70] sm:$0xff]  ;;  %v68_v7 = vld [vmem:[#allocation2 + $0x60] sm:$0xff]  ;;  %50 = vst.msk [vmem:[#allocation5 + $0x20] sm:$0xff] %vm45_vm0, %v66_v5  ;;  %51 = vst.msk [vmem:[#allocation5 + $0x28] sm:$0xff] %vm45_vm0, %v67_v4  ;;  %s528_s6 = scalar_lea.vmem %s437_s5, 2048  ;;  %p533_p9 = scmp.lt.s32.totalorder %s437_s5, %s437_s5 }
  0x19   :  { %v678_v8 = vld [vmem:[#allocation2 + $0x90] sm:$0xff]  ;;  %v70_v9 = vld [vmem:[#allocation2 + $0x80] sm:$0xff]  ;;  %52 = vst.msk [vmem:[#allocation5 + $0x30] sm:$0xff] %vm45_vm0, %v68_v7  ;;  %53 = vst.msk [vmem:[#allocation5 + $0x38] sm:$0xff] %vm45_vm0, %v69_v6  ;;  %p529_p8 = scmp.ne.s32.totalorder %s437_s5, %s528_s6  ;;  %p534_p10 = scmp.lt.s32.totalorder %s528_s6, %s528_s6 }
  0x1a   :  { %v683_v10 = vld [vmem:[#allocation2 + $0xb0] sm:$0xff]  ;;  %v72_v11 = vld [vmem:[#allocation2 + $0xa0] sm:$0xff]  ;;  %55 = vst.msk [vmem:[#allocation5 + $0x48] sm:$0xff] %vm45_vm0, %v678_v8  ;;  %54 = vst.msk [vmem:[#allocation5 + $0x40] sm:$0xff] %vm45_vm0, %v70_v9  ;;  %100 = vrot.lane.b32.xlu1 %v65_v2, %s627_s29 }
  0x1b   :  { %v689_v12 = vld [vmem:[#allocation2 + $0xd0] sm:$0xff]  ;;  %v74_v13 = vld [vmem:[#allocation2 + $0xc0] sm:$0xff]  ;;  %56 = vst.msk [vmem:[#allocation5 + $0x50] sm:$0xff] %vm45_vm0, %v72_v11  ;;  %57 = vst.msk [vmem:[#allocation5 + $0x58] sm:$0xff] %vm45_vm0, %v683_v10  ;;  %96 = vrot.lane.b32.xlu0 %v63_v3, %s627_s29  ;;  %p535_p11 = por %p534_p10, %p533_p9 }
  0x1c   :  { %v691_v14 = vld [vmem:[#allocation2 + $0xf0] sm:$0xff]  ;;  %v76_v15 = vld [vmem:[#allocation2 + $0xe0] sm:$0xff]  ;;  %58 = vst.msk [vmem:[#allocation5 + $0x60] sm:$0xff] %vm45_vm0, %v74_v13  ;;  %59 = vst.msk [vmem:[#allocation5 + $0x68] sm:$0xff] %vm45_vm0, %v689_v12 }
  0x1d   :  { %61 = vst.msk [vmem:[#allocation5 + $0x78] sm:$0xff] %vm45_vm0, %v691_v14  ;;  %60 = vst.msk [vmem:[#allocation5 + $0x70] sm:$0xff] %vm45_vm0, %v76_v15  ;;  %v159_v16 = vld [vmem:[#allocation2 + $0x8] sm:$0xff]  ;;  %v161_v17 = vld [vmem:[#allocation2 + $0x18] sm:$0xff]  ;;  %p536_p12 = pnand %p535_p11, %p529_p8 }
  0x1e   :  { %104 = vrot.lane.b32.xlu1 %v67_v4, %s627_s29  ;;  %v163_v18 = vld [vmem:[#allocation2 + $0x28] sm:$0xff]  ;;  %v165_v19 = vld [vmem:[#allocation2 + $0x38] sm:$0xff] }
  0x1f   :  { %102 = vrot.lane.b32.xlu0 %v66_v5, %s627_s29  ;;  %v167_v20 = vld [vmem:[#allocation2 + $0x48] sm:$0xff]  ;;  %v169_v21 = vld [vmem:[#allocation2 + $0x58] sm:$0xff] }
  0x20   :  { %v171_v22 = vld [vmem:[#allocation2 + $0x68] sm:$0xff]  ;;  %v173_v23 = vld [vmem:[#allocation2 + $0x78] sm:$0xff] }
  0x21   :  { %v175_v24 = vld [vmem:[#allocation2 + $0x88] sm:$0xff]  ;;  %v177_v25 = vld [vmem:[#allocation2 + $0x98] sm:$0xff] }
  0x22   :  { %108 = vrot.lane.b32.xlu1 %v69_v6, %s627_s29  ;;  %v179_v26 = vld [vmem:[#allocation2 + $0xa8] sm:$0xff]  ;;  %v181_v27 = vld [vmem:[#allocation2 + $0xb8] sm:$0xff] }
  0x23   :  { %106 = vrot.lane.b32.xlu0 %v68_v7, %s627_s29  ;;  %v183_v28 = vld [vmem:[#allocation2 + $0xc8] sm:$0xff]  ;;  %v185_v29 = vld [vmem:[#allocation2 + $0xd8] sm:$0xff] }
  0x24   :  { %v187_v30 = vld [vmem:[#allocation2 + $0xe8] sm:$0xff]  ;;  %v189_v31 = vld [vmem:[#allocation2 + $0xf8] sm:$0xff] }
  0x26   :  { %112 = vrot.lane.b32.xlu1 %v678_v8, %s627_s29 }
  0x27   :  { %110 = vrot.lane.b32.xlu0 %v70_v9, %s627_s29 }
  0x2a   :  { %116 = vrot.lane.b32.xlu1 %v683_v10, %s627_s29 }
  0x2b   :  { %114 = vrot.lane.b32.xlu0 %v72_v11, %s627_s29 }
  0x2e   :  { %120 = vrot.lane.b32.xlu1 %v689_v12, %s627_s29 }
  0x2f   :  { %118 = vrot.lane.b32.xlu0 %v74_v13, %s627_s29 }
  0x32   :  { %124 = vrot.lane.b32.xlu1 %v691_v14, %s627_s29 }
  0x33   :  { %122 = vrot.lane.b32.xlu0 %v76_v15, %s627_s29 }
  0x36   :  { %224 = vrot.lane.b32.xlu1 %v159_v16, %s626_s26 }
  0x37   :  { %222 = vrot.lane.b32.xlu0 %v62_v1, %s626_s26 }
  0x3a   :  { %228 = vrot.lane.b32.xlu1 %v161_v17, %s626_s26 }
  0x3b   :  { %226 = vrot.lane.b32.xlu0 %v63_v3, %s626_s26 }
  0x3e   :  { %232 = vrot.lane.b32.xlu1 %v163_v18, %s626_s26 }
  0x3f   :  { %230 = vrot.lane.b32.xlu0 %v64_v0, %s626_s26 }
  0x42   :  { %236 = vrot.lane.b32.xlu1 %v165_v19, %s626_s26 }
  0x43   :  { %234 = vrot.lane.b32.xlu0 %v65_v2, %s626_s26 }
  0x46   :  { %240 = vrot.lane.b32.xlu1 %v167_v20, %s626_s26 }
  0x47   :  { %238 = vrot.lane.b32.xlu0 %v66_v5, %s626_s26 }
  0x4a   :  { %244 = vrot.lane.b32.xlu1 %v169_v21, %s626_s26 }
  0x4b   :  { %242 = vrot.lane.b32.xlu0 %v67_v4, %s626_s26 }
  0x4e   :  { %248 = vrot.lane.b32.xlu1 %v171_v22, %s626_s26 }
  0x4f   :  { %246 = vrot.lane.b32.xlu0 %v68_v7, %s626_s26 }
  0x52   :  { %252 = vrot.lane.b32.xlu1 %v173_v23, %s626_s26 }
  0x53   :  { %250 = vrot.lane.b32.xlu0 %v69_v6, %s626_s26 }
  0x56   :  { %256 = vrot.lane.b32.xlu1 %v175_v24, %s626_s26 }
  0x57   :  { %254 = vrot.lane.b32.xlu0 %v70_v9, %s626_s26 }
  0x5a   :  { %260 = vrot.lane.b32.xlu1 %v177_v25, %s626_s26 }
  0x5b   :  { %258 = vrot.lane.b32.xlu0 %v678_v8, %s626_s26 }
  0x5e   :  { %264 = vrot.lane.b32.xlu1 %v179_v26, %s626_s26 }
  0x5f   :  { %262 = vrot.lane.b32.xlu0 %v72_v11, %s626_s26 }
  0x62   :  { %268 = vrot.lane.b32.xlu1 %v181_v27, %s626_s26 }
  0x63   :  { %266 = vrot.lane.b32.xlu0 %v683_v10, %s626_s26 }
  0x66   :  { %272 = vrot.lane.b32.xlu1 %v183_v28, %s626_s26 }
  0x67   :  { %270 = vrot.lane.b32.xlu0 %v74_v13, %s626_s26 }
  0x6a   :  { %276 = vrot.lane.b32.xlu1 %v185_v29, %s626_s26 }
  0x6b   :  { %274 = vrot.lane.b32.xlu0 %v689_v12, %s626_s26 }
  0x6e   :  { %280 = vrot.lane.b32.xlu1 %v187_v30, %s626_s26 }
  0x6f   :  { %278 = vrot.lane.b32.xlu0 %v76_v15, %s626_s26 }
  0x72   :  { %284 = vrot.lane.b32.xlu1 %v189_v31, %s626_s26 }
  0x73   :  { %282 = vrot.lane.b32.xlu0 %v691_v14, %s626_s26 }
  0x76   :  { %369 = vrot.lane.b32.xlu1 %v161_v17, %s628_s0 }
  0x77   :  { %367 = vrot.lane.b32.xlu0 %v159_v16, %s628_s0 }
  0x7a   :  { %373 = vrot.lane.b32.xlu1 %v165_v19, %s628_s0 }
  0x7b   :  { %371 = vrot.lane.b32.xlu0 %v163_v18, %s628_s0 }
  0x7e   :  { %377 = vrot.lane.b32.xlu1 %v169_v21, %s628_s0 }
  0x7f   :  { %375 = vrot.lane.b32.xlu0 %v167_v20, %s628_s0 }
  0x82   :  { %381 = vrot.lane.b32.xlu1 %v173_v23, %s628_s0 }
  0x83   :  { %379 = vrot.lane.b32.xlu0 %v171_v22, %s628_s0 }
  0x86   :  { %385 = vrot.lane.b32.xlu1 %v177_v25, %s628_s0 }
  0x87   :  { %383 = vrot.lane.b32.xlu0 %v175_v24, %s628_s0 }
  0x88   :  { %539 = shalt.err (!%p536_p12)
}
  0x89   :  { %s540_s9 = scalar_lea.hbm %s898_s1, 2048 }
  0x8a   :  { %p541_p13 = scmp.ne.s32.totalorder %s898_s1, %s540_s9  ;;  %p544_p0 = scmp.lt.u32.totalorder %s540_s9, %s898_s1 }
  0x8c   :  { %p546_p1 = pnand %p544_p0, %p541_p13 }
  0x8e   :  { %549 = shalt.err (!%p546_p1)
}
  0x8f   :  { %s630_s14 = smov 128   ;;  %s631_s15 = smov 8   ;;  %v99_v32 = vpop.permute.xlu1 %98  ;;  %v95_v33 = vpop.permute.xlu0 %94  ;;  %389 = vrot.lane.b32.xlu1 %v181_v27, %s628_s0  ;;  %387 = vrot.lane.b32.xlu0 %v179_v26, %s628_s0  ;;  %vm286_vm1 = vcmask 130048  }
  0x90   :  { %442 = dma.vmem_to_hbm [thread:$0]  %s437_s5, 2048, %s898_s1, [#allocation4], %s630_s14, %s630_s14, %s631_s15   ;;  %144 = vst.msk [vmem:[#allocation6 + $0x10] sm:$0xff] %vm45_vm0, %v99_v32  ;;  %142 = vst.msk [vmem:[#allocation6] sm:$0xff] %vm45_vm0, %v95_v33 }
  0x91   :  { %s632_s1 = smov [#allocation6]  }
  0x92   :  { %s448_s18 = sshll.u32 %s632_s1, 4  ;;  %s449_s18 = int_to_ptr.vmem [resolvable:$true] %s448_s18 }
  0x93   :  { %v101_v34 = vpop.permute.xlu1 %100  ;;  %v97_v35 = vpop.permute.xlu0 %96  ;;  %393 = vrot.lane.b32.xlu1 %v185_v29, %s628_s0  ;;  %391 = vrot.lane.b32.xlu0 %v183_v28, %s628_s0  ;;  %s550_s19 = scalar_lea.vmem %s449_s18, 2048  ;;  %p555_p3 = scmp.lt.s32.totalorder %s449_s18, %s449_s18 }
  0x94   :  { %145 = vst.msk [vmem:[#allocation6 + $0x18] sm:$0xff] %vm45_vm0, %v101_v34  ;;  %143 = vst.msk [vmem:[#allocation6 + $0x8] sm:$0xff] %vm45_vm0, %v97_v35  ;;  %p551_p2 = scmp.ne.s32.totalorder %s449_s18, %s550_s19  ;;  %p556_p4 = scmp.lt.s32.totalorder %s550_s19, %s550_s19 }
  0x96   :  { %p557_p5 = por %p556_p4, %p555_p3 }
  0x97   :  { %v105_v36 = vpop.permute.xlu1 %104  ;;  %v103_v37 = vpop.permute.xlu0 %102  ;;  %397 = vrot.lane.b32.xlu1 %v189_v31, %s628_s0  ;;  %395 = vrot.lane.b32.xlu0 %v187_v30, %s628_s0 }
  0x98   :  { %147 = vst.msk [vmem:[#allocation6 + $0x28] sm:$0xff] %vm45_vm0, %v105_v36  ;;  %146 = vst.msk [vmem:[#allocation6 + $0x20] sm:$0xff] %vm45_vm0, %v103_v37  ;;  %p558_p6 = pnand %p557_p5, %p551_p2 }
  0x9b   :  { %v109_v38 = vpop.permute.xlu1 %108  ;;  %v107_v39 = vpop.permute.xlu0 %106 }
  0x9c   :  { %149 = vst.msk [vmem:[#allocation6 + $0x38] sm:$0xff] %vm45_vm0, %v109_v38  ;;  %148 = vst.msk [vmem:[#allocation6 + $0x30] sm:$0xff] %vm45_vm0, %v107_v39 }
  0x9f   :  { %v113_v40 = vpop.permute.xlu1 %112  ;;  %v111_v41 = vpop.permute.xlu0 %110 }
  0xa0   :  { %151 = vst.msk [vmem:[#allocation6 + $0x48] sm:$0xff] %vm45_vm0, %v113_v40  ;;  %150 = vst.msk [vmem:[#allocation6 + $0x40] sm:$0xff] %vm45_vm0, %v111_v41 }
  0xa3   :  { %v117_v42 = vpop.permute.xlu1 %116  ;;  %v115_v43 = vpop.permute.xlu0 %114 }
  0xa4   :  { %153 = vst.msk [vmem:[#allocation6 + $0x58] sm:$0xff] %vm45_vm0, %v117_v42  ;;  %152 = vst.msk [vmem:[#allocation6 + $0x50] sm:$0xff] %vm45_vm0, %v115_v43 }
  0xa7   :  { %v121_v44 = vpop.permute.xlu1 %120  ;;  %v119_v45 = vpop.permute.xlu0 %118 }
  0xa8   :  { %155 = vst.msk [vmem:[#allocation6 + $0x68] sm:$0xff] %vm45_vm0, %v121_v44  ;;  %154 = vst.msk [vmem:[#allocation6 + $0x60] sm:$0xff] %vm45_vm0, %v119_v45 }
  0xab   :  { %v125_v46 = vpop.permute.xlu1 %124  ;;  %v123_v47 = vpop.permute.xlu0 %122 }
  0xac   :  { %157 = vst.msk [vmem:[#allocation6 + $0x78] sm:$0xff] %vm45_vm0, %v125_v46  ;;  %156 = vst.msk [vmem:[#allocation6 + $0x70] sm:$0xff] %vm45_vm0, %v123_v47 }
  0xad   :  { %561 = shalt.err (!%p558_p6)
}
  0xae   :  { %s562_s22 = scalar_lea.hbm %s899_s2, 2048 }
  0xaf   :  { %p563_p7 = scmp.ne.s32.totalorder %s899_s2, %s562_s22  ;;  %p566_p8 = scmp.lt.u32.totalorder %s562_s22, %s899_s2 }
  0xb1   :  { %p568_p9 = pnand %p566_p8, %p563_p7 }
  0xb3   :  { %571 = shalt.err (!%p568_p9)
}
  0xb4   :  { %454 = dma.vmem_to_hbm [thread:$0]  %s449_s18, 2048, %s899_s2, [#allocation7], %s630_s14, %s630_s14, %s631_s15   ;;  %v225_v48 = vpop.permute.xlu1 %224  ;;  %v223_v49 = vpop.permute.xlu0 %222 }
  0xb5   :  { %v287_v50 = vsel %vm286_vm1, %v223_v49, %v225_v48  ;;  %s633_s2 = smov [#allocation8]  }
  0xb6   :  { %319 = vst.msk [vmem:[#allocation8] sm:$0xff] %vm45_vm0, %v287_v50  ;;  %s460_s29 = sshll.u32 %s633_s2, 4  ;;  %s461_s29 = int_to_ptr.vmem [resolvable:$true] %s460_s29 }
  0xb7   :  { %s572_s0 = scalar_lea.vmem %s461_s29, 2048  ;;  %p577_p11 = scmp.lt.s32.totalorder %s461_s29, %s461_s29 }
  0xb8   :  { %v229_v51 = vpop.permute.xlu1 %228  ;;  %v227_v52 = vpop.permute.xlu0 %226  ;;  %p573_p10 = scmp.ne.s32.totalorder %s461_s29, %s572_s0  ;;  %p578_p12 = scmp.lt.s32.totalorder %s572_s0, %s572_s0 }
  0xb9   :  { %v288_v53 = vsel %vm286_vm1, %v227_v52, %v229_v51 }
  0xba   :  { %320 = vst.msk [vmem:[#allocation8 + $0x8] sm:$0xff] %vm45_vm0, %v288_v53  ;;  %p579_p13 = por %p578_p12, %p577_p11 }
  0xbc   :  { %v233_v54 = vpop.permute.xlu1 %232  ;;  %v231_v55 = vpop.permute.xlu0 %230  ;;  %p580_p0 = pnand %p579_p13, %p573_p10 }
  0xbd   :  { %v289_v56 = vsel %vm286_vm1, %v231_v55, %v233_v54 }
  0xbe   :  { %321 = vst.msk [vmem:[#allocation8 + $0x10] sm:$0xff] %vm45_vm0, %v289_v56 }
  0xc0   :  { %v237_v57 = vpop.permute.xlu1 %236  ;;  %v235_v58 = vpop.permute.xlu0 %234 }
  0xc1   :  { %v290_v59 = vsel %vm286_vm1, %v235_v58, %v237_v57 }
  0xc2   :  { %322 = vst.msk [vmem:[#allocation8 + $0x18] sm:$0xff] %vm45_vm0, %v290_v59 }
  0xc4   :  { %v241_v60 = vpop.permute.xlu1 %240  ;;  %v239_v61 = vpop.permute.xlu0 %238 }
  0xc5   :  { %v291_v62 = vsel %vm286_vm1, %v239_v61, %v241_v60 }
  0xc6   :  { %323 = vst.msk [vmem:[#allocation8 + $0x20] sm:$0xff] %vm45_vm0, %v291_v62 }
  0xc8   :  { %v245_v63 = vpop.permute.xlu1 %244  ;;  %v243_v0 = vpop.permute.xlu0 %242 }
  0xc9   :  { %v292_v1 = vsel %vm286_vm1, %v243_v0, %v245_v63 }
  0xca   :  { %324 = vst.msk [vmem:[#allocation8 + $0x28] sm:$0xff] %vm45_vm0, %v292_v1 }
  0xcc   :  { %v249_v2 = vpop.permute.xlu1 %248  ;;  %v247_v3 = vpop.permute.xlu0 %246 }
  0xcd   :  { %v293_v4 = vsel %vm286_vm1, %v247_v3, %v249_v2 }
  0xce   :  { %325 = vst.msk [vmem:[#allocation8 + $0x30] sm:$0xff] %vm45_vm0, %v293_v4 }
  0xd0   :  { %v253_v5 = vpop.permute.xlu1 %252  ;;  %v251_v6 = vpop.permute.xlu0 %250 }
  0xd1   :  { %v294_v7 = vsel %vm286_vm1, %v251_v6, %v253_v5 }
  0xd2   :  { %326 = vst.msk [vmem:[#allocation8 + $0x38] sm:$0xff] %vm45_vm0, %v294_v7 }
  0xd4   :  { %v257_v8 = vpop.permute.xlu1 %256  ;;  %v255_v9 = vpop.permute.xlu0 %254 }
  0xd5   :  { %v295_v10 = vsel %vm286_vm1, %v255_v9, %v257_v8 }
  0xd6   :  { %327 = vst.msk [vmem:[#allocation8 + $0x40] sm:$0xff] %vm45_vm0, %v295_v10 }
  0xd8   :  { %v261_v11 = vpop.permute.xlu1 %260  ;;  %v259_v12 = vpop.permute.xlu0 %258 }
  0xd9   :  { %v296_v13 = vsel %vm286_vm1, %v259_v12, %v261_v11 }
  0xda   :  { %328 = vst.msk [vmem:[#allocation8 + $0x48] sm:$0xff] %vm45_vm0, %v296_v13 }
  0xdc   :  { %v265_v14 = vpop.permute.xlu1 %264  ;;  %v263_v15 = vpop.permute.xlu0 %262 }
  0xdd   :  { %v297_v16 = vsel %vm286_vm1, %v263_v15, %v265_v14 }
  0xde   :  { %329 = vst.msk [vmem:[#allocation8 + $0x50] sm:$0xff] %vm45_vm0, %v297_v16 }
  0xe0   :  { %v269_v17 = vpop.permute.xlu1 %268  ;;  %v267_v18 = vpop.permute.xlu0 %266 }
  0xe1   :  { %v298_v19 = vsel %vm286_vm1, %v267_v18, %v269_v17 }
  0xe2   :  { %330 = vst.msk [vmem:[#allocation8 + $0x58] sm:$0xff] %vm45_vm0, %v298_v19 }
  0xe4   :  { %v273_v20 = vpop.permute.xlu1 %272  ;;  %v271_v21 = vpop.permute.xlu0 %270 }
  0xe5   :  { %v299_v22 = vsel %vm286_vm1, %v271_v21, %v273_v20 }
  0xe6   :  { %331 = vst.msk [vmem:[#allocation8 + $0x60] sm:$0xff] %vm45_vm0, %v299_v22 }
  0xe8   :  { %v277_v23 = vpop.permute.xlu1 %276  ;;  %v275_v24 = vpop.permute.xlu0 %274 }
  0xe9   :  { %v300_v25 = vsel %vm286_vm1, %v275_v24, %v277_v23 }
  0xea   :  { %332 = vst.msk [vmem:[#allocation8 + $0x68] sm:$0xff] %vm45_vm0, %v300_v25 }
  0xec   :  { %v281_v26 = vpop.permute.xlu1 %280  ;;  %v279_v27 = vpop.permute.xlu0 %278 }
  0xed   :  { %v301_v28 = vsel %vm286_vm1, %v279_v27, %v281_v26 }
  0xee   :  { %333 = vst.msk [vmem:[#allocation8 + $0x70] sm:$0xff] %vm45_vm0, %v301_v28 }
  0xf0   :  { %v285_v29 = vpop.permute.xlu1 %284  ;;  %v283_v30 = vpop.permute.xlu0 %282 }
  0xf1   :  { %v302_v31 = vsel %vm286_vm1, %v283_v30, %v285_v29 }
  0xf2   :  { %334 = vst.msk [vmem:[#allocation8 + $0x78] sm:$0xff] %vm45_vm0, %v302_v31 }
  0xf3   :  { %583 = shalt.err (!%p580_p0)
}
  0xf4   :  { %s584_s6 = scalar_lea.hbm %s900_s3, 2048 }
  0xf5   :  { %p585_p1 = scmp.ne.s32.totalorder %s900_s3, %s584_s6  ;;  %p588_p2 = scmp.lt.u32.totalorder %s584_s6, %s900_s3 }
  0xf7   :  { %p590_p3 = pnand %p588_p2, %p585_p1 }
  0xf9   :  { %593 = shalt.err (!%p590_p3)
}
  0xfa   :  { %466 = dma.vmem_to_hbm [thread:$0]  %s461_s29, 2048, %s900_s3, [#allocation7], %s630_s14, %s630_s14, %s631_s15   ;;  %v370_v32 = vpop.permute.xlu1 %369  ;;  %v368_v33 = vpop.permute.xlu0 %367 }
  0xfb   :  { %416 = vst.msk [vmem:[#allocation9 + $0x8] sm:$0xff] %vm45_vm0, %v370_v32  ;;  %415 = vst.msk [vmem:[#allocation9] sm:$0xff] %vm45_vm0, %v368_v33  ;;  %s634_s3 = smov [#allocation9]  }
  0xfc   :  { %s472_s13 = sshll.u32 %s634_s3, 4  ;;  %s473_s13 = int_to_ptr.vmem [resolvable:$true] %s472_s13 }
  0xfd   :  { %s594_s16 = scalar_lea.vmem %s473_s13, 2048  ;;  %p599_p5 = scmp.lt.s32.totalorder %s473_s13, %s473_s13 }
  0xfe   :  { %v374_v34 = vpop.permute.xlu1 %373  ;;  %v372_v35 = vpop.permute.xlu0 %371  ;;  %p595_p4 = scmp.ne.s32.totalorder %s473_s13, %s594_s16  ;;  %p600_p6 = scmp.lt.s32.totalorder %s594_s16, %s594_s16 }
  0xff   :  { %418 = vst.msk [vmem:[#allocation9 + $0x18] sm:$0xff] %vm45_vm0, %v374_v34  ;;  %417 = vst.msk [vmem:[#allocation9 + $0x10] sm:$0xff] %vm45_vm0, %v372_v35 }
 0x100   :  { %p601_p7 = por %p600_p6, %p599_p5 }
 0x102   :  { %v378_v36 = vpop.permute.xlu1 %377  ;;  %v376_v37 = vpop.permute.xlu0 %375  ;;  %p602_p8 = pnand %p601_p7, %p595_p4 }
 0x103   :  { %420 = vst.msk [vmem:[#allocation9 + $0x28] sm:$0xff] %vm45_vm0, %v378_v36  ;;  %419 = vst.msk [vmem:[#allocation9 + $0x20] sm:$0xff] %vm45_vm0, %v376_v37 }
 0x106   :  { %v382_v38 = vpop.permute.xlu1 %381  ;;  %v380_v39 = vpop.permute.xlu0 %379 }
 0x107   :  { %422 = vst.msk [vmem:[#allocation9 + $0x38] sm:$0xff] %vm45_vm0, %v382_v38  ;;  %421 = vst.msk [vmem:[#allocation9 + $0x30] sm:$0xff] %vm45_vm0, %v380_v39 }
 0x10a   :  { %v386_v40 = vpop.permute.xlu1 %385  ;;  %v384_v41 = vpop.permute.xlu0 %383 }
 0x10b   :  { %424 = vst.msk [vmem:[#allocation9 + $0x48] sm:$0xff] %vm45_vm0, %v386_v40  ;;  %423 = vst.msk [vmem:[#allocation9 + $0x40] sm:$0xff] %vm45_vm0, %v384_v41 }
 0x10e   :  { %v390_v42 = vpop.permute.xlu1 %389  ;;  %v388_v43 = vpop.permute.xlu0 %387 }
 0x10f   :  { %426 = vst.msk [vmem:[#allocation9 + $0x58] sm:$0xff] %vm45_vm0, %v390_v42  ;;  %425 = vst.msk [vmem:[#allocation9 + $0x50] sm:$0xff] %vm45_vm0, %v388_v43 }
 0x112   :  { %v394_v44 = vpop.permute.xlu1 %393  ;;  %v392_v45 = vpop.permute.xlu0 %391 }
 0x113   :  { %428 = vst.msk [vmem:[#allocation9 + $0x68] sm:$0xff] %vm45_vm0, %v394_v44  ;;  %427 = vst.msk [vmem:[#allocation9 + $0x60] sm:$0xff] %vm45_vm0, %v392_v45 }
 0x116   :  { %v398_v46 = vpop.permute.xlu1 %397  ;;  %v396_v47 = vpop.permute.xlu0 %395 }
 0x117   :  { %430 = vst.msk [vmem:[#allocation9 + $0x78] sm:$0xff] %vm45_vm0, %v398_v46  ;;  %429 = vst.msk [vmem:[#allocation9 + $0x70] sm:$0xff] %vm45_vm0, %v396_v47 }
 0x118   :  { %605 = shalt.err (!%p602_p8)
}
 0x119   :  { %s606_s18 = scalar_lea.hbm %s901_s4, 2048 }
 0x11a   :  { %p607_p9 = scmp.ne.s32.totalorder %s901_s4, %s606_s18  ;;  %p610_p10 = scmp.lt.u32.totalorder %s606_s18, %s901_s4 }
 0x11c   :  { %p612_p11 = pnand %p610_p10, %p607_p9 }
 0x11e   :  { %615 = shalt.err (!%p612_p11)
}
 0x11f   :  { %478 = dma.vmem_to_hbm [thread:$0]  %s473_s13, 2048, %s901_s4, [#allocation10], %s630_s14, %s630_s14, %s631_s15  }
 0x120   :  { %618 = dma.done.wait [#allocation4], 2048  }
 0x121   :  { %619 = vsyncadd [#allocation4], 4294965248 }
 0x122   :  { %620 = dma.done.wait [#allocation7], 4096  }
 0x123   :  { %621 = vsyncadd [#allocation7], 4294963200 }
 0x124   :  { %622 = dma.done.wait [#allocation10], 2048  }
 0x125   :  { %623 = vsyncadd [#allocation10], 4294965248 }
 0x126   :  { %491 = vsyncpa [#allocation3], 1 }
 0x127   :  { %492 = vsyncpa [#allocation4], 1 }
 0x128   :  { %493 = vsyncpa [#allocation7], 1 }
 0x129   :  { %494 = vsyncpa [#allocation10], 1 }

</bundles_post_ra>
